<compile_context>
chip_gen: v5e
topology: v5e:2x2
jax: 0.10.0
libtpu: 0.0.40
codegen_flags: <defaults>
</compile_context>

<pallas_src>
import functools

import jax
import jax.numpy as jnp
from jax.experimental import pallas as pl
from jax.experimental.pallas import tpu as pltpu

BN_EPS = 1e-5


def _round_up(v, m):
    return ((v + m - 1) // m) * m


def _pad2(a, rows, cols):
    return jnp.pad(a, ((0, rows - a.shape[0]), (0, cols - a.shape[1])))


# ---------------------------------------------------------------------------
# Fused Pallas kernel
# ---------------------------------------------------------------------------
def fused_gnn_kernel(adj_ref, x_ref,
                     w1_ref, b1_ref, w2_ref, b2_ref, w3_ref, b3_ref,
                     pool_ref, wfc_ref, bfc_ref,
                     out_ref, *, n_real):
    """3 x ReLU(A_hat @ (H @ W') + b') + mean-pool + Linear.

    H is chained as a value (bf16 for the MXU, f32 epilogue), never stored to
    scratch between layers.  BN is pre-folded into W'/b'; dropout = identity.
    """
    adj = adj_ref[...]                                          # bf16 [Np, Np]
    n_p = adj_ref.shape[0]

    # Row mask: zero the padded node rows (which would otherwise be relu(b')).
    row_ids = jax.lax.broadcasted_iota(jnp.int32, (n_p, 1), 0)
    row_mask = (row_ids < n_real).astype(jnp.float32)           # [Np, 1]

    def layer(h_bf16, w_ref, b_ref):
        # X @ W'  (bf16 MXU, f32 accumulation)
        xw = jnp.dot(h_bf16, w_ref[...], preferred_element_type=jnp.float32)
        # A_hat @ (X @ W')
        h = jnp.dot(adj, xw.astype(jnp.bfloat16),
                    preferred_element_type=jnp.float32)
        # bias + ReLU (f32 VPU), zero padded rows, single down-cast to bf16.
        h = jnp.maximum(h + b_ref[...], 0.0) * row_mask
        return h.astype(jnp.bfloat16)

    h = layer(x_ref[...], w1_ref, b1_ref)                       # layer 1
    h = layer(h, w2_ref, b2_ref)                                # layer 2
    h = layer(h, w3_ref, b3_ref)                                # layer 3

    # global_mean_pool (bf16 MXU, K = node count) + fc (tiny, f32)
    pooled = jnp.dot(pool_ref[...], h, preferred_element_type=jnp.float32)
    out_ref[...] = jnp.dot(pooled, wfc_ref[...],
                           preferred_element_type=jnp.float32) + bfc_ref[...]


# ---------------------------------------------------------------------------
# Host-side glue: BN folding, padding, normalized adjacency, pooling matrix
# ---------------------------------------------------------------------------
def fold_bn(w, b, gamma, beta, mean, var):
    """GCN bias + BatchNorm1d(running stats) folded into (W', b')."""
    scale = gamma * jax.lax.rsqrt(var + BN_EPS)                  # [F_out]
    return w * scale[None, :], (b - mean) * scale + beta


def gcn_norm_adj(edge_index, num_nodes):
    """A_hat = D^{-1/2} (A + I) D^{-1/2} as a dense [N, N] matrix."""
    src, dst = edge_index[0], edge_index[1]
    a = jnp.zeros((num_nodes, num_nodes), jnp.float32)
    # scatter-ADD (matches PyG: duplicate edges are counted)
    a = a.at[dst, src].add(1.0)
    a = a + jnp.eye(num_nodes, dtype=jnp.float32)                # self loops
    deg = jnp.sum(a, axis=1)
    d_inv_sqrt = jnp.where(deg > 0, jax.lax.rsqrt(deg), 0.0)
    return a * d_inv_sqrt[:, None] * d_inv_sqrt[None, :]


def mean_pool_matrix(batch, num_nodes, num_graphs):
    """P[g, n] = 1/count(g) if batch[n] == g else 0."""
    onehot = (batch[None, :] == jnp.arange(num_graphs)[:, None]).astype(jnp.float32)
    counts = jnp.maximum(jnp.sum(onehot, axis=1, keepdims=True), 1.0)
    return onehot / counts


def glorot(key, shape):
    fan_in, fan_out = shape
    limit = jnp.sqrt(6.0 / (fan_in + fan_out))
    return jax.random.uniform(key, shape, jnp.float32, -limit, limit)


def init_params(key, input_dim, hidden_dim, output_dim):
    ks = jax.random.split(key, 4)
    params = {
        "w1": glorot(ks[0], (input_dim, hidden_dim)),
        "b1": jnp.zeros((hidden_dim,), jnp.float32),
        "w2": glorot(ks[1], (hidden_dim, hidden_dim)),
        "b2": jnp.zeros((hidden_dim,), jnp.float32),
        "w3": glorot(ks[2], (hidden_dim, hidden_dim)),
        "b3": jnp.zeros((hidden_dim,), jnp.float32),
        "w_fc": glorot(ks[3], (hidden_dim, output_dim)),
        "b_fc": jnp.zeros((output_dim,), jnp.float32),
    }
    for i in (1, 2, 3):  # BatchNorm1d default init (eval / running stats)
        params[f"bn{i}_gamma"] = jnp.ones((hidden_dim,), jnp.float32)
        params[f"bn{i}_beta"] = jnp.zeros((hidden_dim,), jnp.float32)
        params[f"bn{i}_mean"] = jnp.zeros((hidden_dim,), jnp.float32)
        params[f"bn{i}_var"] = jnp.ones((hidden_dim,), jnp.float32)
    return params


def _vmem_limit_bytes(operands, out_bytes, n_p, hid_p):
    """Operand + working-set bytes, +50% headroom, clamped to ~80% physical."""
    operand_bytes = sum(int(o.size) * o.dtype.itemsize for o in operands)
    # live in-kernel values: xw (f32) + h (f32) + h (bf16) + row mask
    work_bytes = n_p * hid_p * (4 + 4 + 2) + n_p * 4
    need = int((operand_bytes + out_bytes + work_bytes) * 1.5) + (2 << 20)
    try:
        phys = int(pltpu.get_tpu_info().vmem_capacity_bytes)
    except Exception:
        phys = 64 << 20                       # conservative: v7x per-core VMEM
    cap = int(phys * 0.8)                     # never request the whole thing
    return max(8 << 20, min(need, cap))


def gnn_forward(params, x, adj, pool_mat, output_dim):
    n, f_in = x.shape
    hidden = params["w1"].shape[1]
    num_graphs = pool_mat.shape[0]

    # ---- padded (lane/sublane friendly) sizes; node dim is lane-dense (128)
    n_p = _round_up(max(n, 128), 128)
    fin_p = _round_up(max(f_in, 128), 128)
    hid_p = _round_up(max(hidden, 128), 128)
    out_p = _round_up(max(output_dim, 128), 128)
    g_p = _round_up(max(num_graphs, 8), 8)

    # ---- fold BN + bias into weights
    w1, b1 = fold_bn(params["w1"], params["b1"], params["bn1_gamma"],
                     params["bn1_beta"], params["bn1_mean"], params["bn1_var"])
    w2, b2 = fold_bn(params["w2"], params["b2"], params["bn2_gamma"],
                     params["bn2_beta"], params["bn2_mean"], params["bn2_var"])
    w3, b3 = fold_bn(params["w3"], params["b3"], params["bn3_gamma"],
                     params["bn3_beta"], params["bn3_mean"], params["bn3_var"])

    # ---- pad + cast MXU operands to bf16 (halves A_hat / X / W / pool DMA)
    adj_p = _pad2(adj, n_p, n_p).astype(jnp.bfloat16)
    x_p = _pad2(x, n_p, fin_p).astype(jnp.bfloat16)
    w1_p = _pad2(w1, fin_p, hid_p).astype(jnp.bfloat16)
    w2_p = _pad2(w2, hid_p, hid_p).astype(jnp.bfloat16)
    w3_p = _pad2(w3, hid_p, hid_p).astype(jnp.bfloat16)
    b1_p = _pad2(b1.reshape(1, -1), 1, hid_p)                    # f32
    b2_p = _pad2(b2.reshape(1, -1), 1, hid_p)
    b3_p = _pad2(b3.reshape(1, -1), 1, hid_p)
    pool_p = _pad2(pool_mat, g_p, n_p).astype(jnp.bfloat16)      # bf16
    wfc_p = _pad2(params["w_fc"], hid_p, out_p)                  # f32 (tiny)
    bfc_p = _pad2(params["b_fc"].reshape(1, -1), 1, out_p)       # f32

    # ---- cost estimate (advisory)
    flops = (2 * n_p * fin_p * hid_p + 2 * n_p * n_p * hid_p          # layer 1
             + 2 * (2 * n_p * hid_p * hid_p + 2 * n_p * n_p * hid_p)  # 2 & 3
             + 2 * g_p * n_p * hid_p                                  # pool
             + 2 * g_p * hid_p * out_p)                               # fc
    operands = (adj_p, x_p, w1_p, b1_p, w2_p, b2_p, w3_p, b3_p,
                pool_p, wfc_p, bfc_p)
    out_bytes = g_p * out_p * 4
    bytes_accessed = sum(int(o.size) * o.dtype.itemsize for o in operands)
    bytes_accessed += out_bytes

    kernel = functools.partial(fused_gnn_kernel, n_real=n)
    vmem_spec = pl.BlockSpec(memory_space=pltpu.MemorySpace.VMEM)
    out = pl.pallas_call(
        kernel,
        out_shape=jax.ShapeDtypeStruct((g_p, out_p), jnp.float32),
        in_specs=[vmem_spec] * len(operands),
        out_specs=vmem_spec,
        compiler_params=pltpu.CompilerParams(
            vmem_limit_bytes=_vmem_limit_bytes(operands, out_bytes, n_p, hid_p)),
        cost_estimate=pl.CostEstimate(flops=int(flops), transcendentals=0,
                                      bytes_accessed=int(bytes_accessed)),
    )(*operands)

    return out[:num_graphs, :output_dim]


# ---------------------------------------------------------------------------
if __name__ == "__main__":
    num_nodes = 16
    input_dim, hidden_dim, output_dim = 8, 32, 4
    num_graphs = 2

    key = jax.random.PRNGKey(0)
    k_x, k_p = jax.random.split(key)

    # Node features [N, input_dim]
    x = jax.random.normal(k_x, (num_nodes, input_dim), jnp.float32)

    # Two ring graphs of 8 nodes each (undirected: both directions listed)
    edges = []
    for g in range(num_graphs):
        base = g * 8
        for i in range(8):
            a, b = base + i, base + (i + 1) % 8
            edges.append((a, b))
            edges.append((b, a))
    edge_index = jnp.array(list(zip(*edges)), dtype=jnp.int32)   # [2, E]

    # batch vector: nodes 0-7 -> graph 0, 8-15 -> graph 1
    batch = jnp.repeat(jnp.arange(num_graphs, dtype=jnp.int32), 8)

    adj = gcn_norm_adj(edge_index, num_nodes)
    pool_mat = mean_pool_matrix(batch, num_nodes, num_graphs)
    params = init_params(k_p, input_dim, hidden_dim, output_dim)

    out = gnn_forward(params, x, adj, pool_mat, output_dim)
    jax.block_until_ready(out)
    assert out.shape == (num_graphs, output_dim)
    print("KERNEL_OK")
</pallas_src>

<mosaic_0001>
module attributes {stable_mosaic.version = 11 : i64} {
  func.func @fused_gnn_kernel(%arg0: memref<128x128xbf16, #tpu.memory_space<vmem>>, %arg1: memref<128x128xbf16, #tpu.memory_space<vmem>>, %arg2: memref<128x128xbf16, #tpu.memory_space<vmem>>, %arg3: memref<1x128xf32, #tpu.memory_space<vmem>>, %arg4: memref<128x128xbf16, #tpu.memory_space<vmem>>, %arg5: memref<1x128xf32, #tpu.memory_space<vmem>>, %arg6: memref<128x128xbf16, #tpu.memory_space<vmem>>, %arg7: memref<1x128xf32, #tpu.memory_space<vmem>>, %arg8: memref<8x128xbf16, #tpu.memory_space<vmem>>, %arg9: memref<128x128xf32, #tpu.memory_space<vmem>>, %arg10: memref<1x128xf32, #tpu.memory_space<vmem>>, %arg11: memref<8x128xf32, #tpu.memory_space<vmem>>) attributes {dimension_semantics = [], scalar_prefetch = 0 : i64, scratch_operands = 0 : i64, tpu.core_type = #tpu.core_type<tc>} {
    %c0 = arith.constant 0 : index
    %c0_0 = arith.constant 0 : index
    %0 = vector.load %arg0[%c0, %c0_0] : memref<128x128xbf16, #tpu.memory_space<vmem>>, vector<128x128xbf16>
    %1 = tpu.iota {dimensions = array<i32: 0>} : vector<128x1xi32>
    %c16_i32 = arith.constant 16 : i32
    %2 = vector.broadcast %c16_i32 : i32 to vector<128x1xi32>
    %3 = arith.cmpi slt, %1, %2 : vector<128x1xi32>
    %4 = arith.extui %3 : vector<128x1xi1> to vector<128x1xi32>
    %5 = arith.sitofp %4 : vector<128x1xi32> to vector<128x1xf32>
    %c0_1 = arith.constant 0 : index
    %c0_2 = arith.constant 0 : index
    %6 = vector.load %arg1[%c0_1, %c0_2] : memref<128x128xbf16, #tpu.memory_space<vmem>>, vector<128x128xbf16>
    %c0_3 = arith.constant 0 : index
    %c0_4 = arith.constant 0 : index
    %7 = vector.load %arg2[%c0_3, %c0_4] : memref<128x128xbf16, #tpu.memory_space<vmem>>, vector<128x128xbf16>
    %cst = arith.constant dense<0.000000e+00> : vector<128x128xf32>
    %8 = tpu.matmul %6, %7, %cst {dimension_numbers = #tpu.dot_dimension_numbers<[1], [0], [0], [1], [0, 0, 1, 1], [], []>} : vector<128x128xbf16>, vector<128x128xbf16>, vector<128x128xf32> -> vector<128x128xf32>
    %9 = arith.truncf %8 : vector<128x128xf32> to vector<128x128xbf16>
    %cst_5 = arith.constant dense<0.000000e+00> : vector<128x128xf32>
    %10 = tpu.matmul %0, %9, %cst_5 {dimension_numbers = #tpu.dot_dimension_numbers<[1], [0], [0], [1], [0, 0, 1, 1], [], []>} : vector<128x128xbf16>, vector<128x128xbf16>, vector<128x128xf32> -> vector<128x128xf32>
    %c0_6 = arith.constant 0 : index
    %c0_7 = arith.constant 0 : index
    %11 = vector.load %arg3[%c0_6, %c0_7] : memref<1x128xf32, #tpu.memory_space<vmem>>, vector<1x128xf32>
    %12 = vector.broadcast %11 : vector<1x128xf32> to vector<128x128xf32>
    %13 = arith.addf %10, %12 : vector<128x128xf32>
    %cst_8 = arith.constant 0.000000e+00 : f32
    %14 = vector.broadcast %cst_8 : f32 to vector<128x128xf32>
    %15 = arith.maximumf %13, %14 : vector<128x128xf32>
    %16 = vector.broadcast %5 : vector<128x1xf32> to vector<128x128xf32>
    %17 = arith.mulf %15, %16 : vector<128x128xf32>
    %18 = arith.truncf %17 : vector<128x128xf32> to vector<128x128xbf16>
    %c0_9 = arith.constant 0 : index
    %c0_10 = arith.constant 0 : index
    %19 = vector.load %arg4[%c0_9, %c0_10] : memref<128x128xbf16, #tpu.memory_space<vmem>>, vector<128x128xbf16>
    %cst_11 = arith.constant dense<0.000000e+00> : vector<128x128xf32>
    %20 = tpu.matmul %18, %19, %cst_11 {dimension_numbers = #tpu.dot_dimension_numbers<[1], [0], [0], [1], [0, 0, 1, 1], [], []>} : vector<128x128xbf16>, vector<128x128xbf16>, vector<128x128xf32> -> vector<128x128xf32>
    %21 = arith.truncf %20 : vector<128x128xf32> to vector<128x128xbf16>
    %cst_12 = arith.constant dense<0.000000e+00> : vector<128x128xf32>
    %22 = tpu.matmul %0, %21, %cst_12 {dimension_numbers = #tpu.dot_dimension_numbers<[1], [0], [0], [1], [0, 0, 1, 1], [], []>} : vector<128x128xbf16>, vector<128x128xbf16>, vector<128x128xf32> -> vector<128x128xf32>
    %c0_13 = arith.constant 0 : index
    %c0_14 = arith.constant 0 : index
    %23 = vector.load %arg5[%c0_13, %c0_14] : memref<1x128xf32, #tpu.memory_space<vmem>>, vector<1x128xf32>
    %24 = vector.broadcast %23 : vector<1x128xf32> to vector<128x128xf32>
    %25 = arith.addf %22, %24 : vector<128x128xf32>
    %cst_15 = arith.constant 0.000000e+00 : f32
    %26 = vector.broadcast %cst_15 : f32 to vector<128x128xf32>
    %27 = arith.maximumf %25, %26 : vector<128x128xf32>
    %28 = vector.broadcast %5 : vector<128x1xf32> to vector<128x128xf32>
    %29 = arith.mulf %27, %28 : vector<128x128xf32>
    %30 = arith.truncf %29 : vector<128x128xf32> to vector<128x128xbf16>
    %c0_16 = arith.constant 0 : index
    %c0_17 = arith.constant 0 : index
    %31 = vector.load %arg6[%c0_16, %c0_17] : memref<128x128xbf16, #tpu.memory_space<vmem>>, vector<128x128xbf16>
    %cst_18 = arith.constant dense<0.000000e+00> : vector<128x128xf32>
    %32 = tpu.matmul %30, %31, %cst_18 {dimension_numbers = #tpu.dot_dimension_numbers<[1], [0], [0], [1], [0, 0, 1, 1], [], []>} : vector<128x128xbf16>, vector<128x128xbf16>, vector<128x128xf32> -> vector<128x128xf32>
    %33 = arith.truncf %32 : vector<128x128xf32> to vector<128x128xbf16>
    %cst_19 = arith.constant dense<0.000000e+00> : vector<128x128xf32>
    %34 = tpu.matmul %0, %33, %cst_19 {dimension_numbers = #tpu.dot_dimension_numbers<[1], [0], [0], [1], [0, 0, 1, 1], [], []>} : vector<128x128xbf16>, vector<128x128xbf16>, vector<128x128xf32> -> vector<128x128xf32>
    %c0_20 = arith.constant 0 : index
    %c0_21 = arith.constant 0 : index
    %35 = vector.load %arg7[%c0_20, %c0_21] : memref<1x128xf32, #tpu.memory_space<vmem>>, vector<1x128xf32>
    %36 = vector.broadcast %35 : vector<1x128xf32> to vector<128x128xf32>
    %37 = arith.addf %34, %36 : vector<128x128xf32>
    %cst_22 = arith.constant 0.000000e+00 : f32
    %38 = vector.broadcast %cst_22 : f32 to vector<128x128xf32>
    %39 = arith.maximumf %37, %38 : vector<128x128xf32>
    %40 = vector.broadcast %5 : vector<128x1xf32> to vector<128x128xf32>
    %41 = arith.mulf %39, %40 : vector<128x128xf32>
    %42 = arith.truncf %41 : vector<128x128xf32> to vector<128x128xbf16>
    %c0_23 = arith.constant 0 : index
    %c0_24 = arith.constant 0 : index
    %43 = vector.load %arg8[%c0_23, %c0_24] : memref<8x128xbf16, #tpu.memory_space<vmem>>, vector<8x128xbf16>
    %cst_25 = arith.constant dense<0.000000e+00> : vector<8x128xf32>
    %44 = tpu.matmul %43, %42, %cst_25 {dimension_numbers = #tpu.dot_dimension_numbers<[1], [0], [0], [1], [0, 0, 1, 1], [], []>} : vector<8x128xbf16>, vector<128x128xbf16>, vector<8x128xf32> -> vector<8x128xf32>
    %c0_26 = arith.constant 0 : index
    %c0_27 = arith.constant 0 : index
    %45 = vector.load %arg9[%c0_26, %c0_27] : memref<128x128xf32, #tpu.memory_space<vmem>>, vector<128x128xf32>
    %cst_28 = arith.constant dense<0.000000e+00> : vector<8x128xf32>
    %46 = tpu.matmul %44, %45, %cst_28 {dimension_numbers = #tpu.dot_dimension_numbers<[1], [0], [0], [1], [0, 0, 1, 1], [], []>} : vector<8x128xf32>, vector<128x128xf32>, vector<8x128xf32> -> vector<8x128xf32>
    %c0_29 = arith.constant 0 : index
    %c0_30 = arith.constant 0 : index
    %47 = vector.load %arg10[%c0_29, %c0_30] : memref<1x128xf32, #tpu.memory_space<vmem>>, vector<1x128xf32>
    %48 = vector.broadcast %47 : vector<1x128xf32> to vector<8x128xf32>
    %49 = arith.addf %46, %48 : vector<8x128xf32>
    %c0_31 = arith.constant 0 : index
    %c0_32 = arith.constant 0 : index
    %50 = vector.load %arg11[%c0_31, %c0_32] : memref<8x128xf32, #tpu.memory_space<vmem>>, vector<8x128xf32>
    tpu.vector_store %arg11[%c0_31, %c0_32], %49 {strides = array<i32>} : memref<8x128xf32, #tpu.memory_space<vmem>>, vector<8x128xf32>,
    return
  }
}

</mosaic_0001>

<bundles_post_ra>
// kernel: tpu_custom_call.1
= control target key start
LH: loop header
LB: loop body
LE: loop exit
PB: predicated region body
PF: predicated region fallthrough
CT: control target
= control target key end

     0   :  { %16 = vsyncpa [#allocation3], 0  ;;  %s1671_s0 = inlined_call_operand.hbm [shape: bf16[128,128], index: 0, kind: input, shape index: {}]   ;;  %s1672_s1 = inlined_call_operand.hbm [shape: bf16[128,128], index: 1, kind: input, shape index: {}]   ;;  %s1673_s2 = inlined_call_operand.hbm [shape: bf16[128,128], index: 2, kind: input, shape index: {}]   ;;  %s1674_s3 = inlined_call_operand.vmem [shape: f32[1,128], index: 3, kind: input, shape index: {}]   ;;  %s1675_s4 = inlined_call_operand.hbm [shape: bf16[128,128], index: 4, kind: input, shape index: {}]   ;;  %s1676_s5 = inlined_call_operand.vmem [shape: f32[1,128], index: 5, kind: input, shape index: {}]   ;;  %s1677_s6 = inlined_call_operand.hbm [shape: bf16[128,128], index: 6, kind: input, shape index: {}]   ;;  %s1678_s7 = inlined_call_operand.vmem [shape: f32[1,128], index: 7, kind: input, shape index: {}]   ;;  %s1679_s8 = inlined_call_operand.vmem [shape: bf16[8,128], index: 8, kind: input, shape index: {}]   ;;  %s1680_s9 = inlined_call_operand.hbm [shape: f32[128,128], index: 9, kind: input, shape index: {}]   ;;  %s1681_s10 = inlined_call_operand.vmem [shape: f32[1,128], index: 10, kind: input, shape index: {}]   ;;  %s1682_s11 = inlined_call_operand.hbm [shape: f32[8,128], index: 11, kind: output, shape index: {}]  }
   0x1   :  { %17 = vsyncpa [#allocation6], 0 }
   0x2   :  { %18 = vsyncpa [#allocation9], 0 }
   0x3   :  { %19 = vsyncpa [#allocation12], 0 }
   0x4   :  { %20 = vsyncpa [#allocation4], 0  ;;  %s38_s19 = sshll.u32 %s1672_s1, 4  ;;  %s1452_s20 = smov [#allocation5]   ;;  %s39_s19 = int_to_ptr.hbm [resolvable:$true] %s38_s19 }
   0x5   :  { %s40_s21 = sshll.u32 %s1452_s20, 4  ;;  %s66_s24 = sshll.u32 %s1675_s4, 4  ;;  %s41_s21 = int_to_ptr.vmem [resolvable:$true] %s40_s21  ;;  %s67_s24 = int_to_ptr.hbm [resolvable:$true] %s66_s24 }
   0x6   :  { %s1453_s25 = smov 64   ;;  %s1454_s26 = smov 4  }
   0x7   :  { %46 = dma.hbm_to_vmem [thread:$0]  %s39_s19, 1024, %s41_s21, [#allocation6], %s1453_s25, %s1453_s25, %s1454_s26  }
   0x8   :  { %s1455_s27 = smov [#allocation8]   ;;  %s25_s1 = sshll.u32 %s1671_s0, 4  ;;  %s26_s1 = int_to_ptr.hbm [resolvable:$true] %s25_s1 }
   0x9   :  { %s68_s28 = sshll.u32 %s1455_s27, 4  ;;  %s51_s13 = sshll.u32 %s1673_s2, 4  ;;  %s69_s28 = int_to_ptr.vmem [resolvable:$true] %s68_s28  ;;  %s52_s13 = int_to_ptr.hbm [resolvable:$true] %s51_s13 }
   0xa   :  { %74 = dma.hbm_to_vmem [thread:$0]  %s67_s24, 1024, %s69_s28, [#allocation9], %s1453_s25, %s1453_s25, %s1454_s26  }
   0xb   :  { %s1456_s14 = smov [#allocation2]   ;;  %s1457_s16 = smov [#allocation7]  }
   0xc   :  { %s27_s15 = sshll.u32 %s1456_s14, 4  ;;  %s53_s0 = sshll.u32 %s1457_s16, 4  ;;  %s28_s15 = int_to_ptr.vmem [resolvable:$true] %s27_s15  ;;  %s54_s0 = int_to_ptr.vmem [resolvable:$true] %s53_s0 }
   0xd   :  { %33 = dma.hbm_to_vmem [thread:$0]  %s26_s1, 1024, %s28_s15, [#allocation3], %s1453_s25, %s1453_s25, %s1454_s26  }
   0xe   :  { %s81_s19 = sshll.u32 %s1677_s6, 4  ;;  %s98_s21 = sshll.u32 %s1680_s9, 4  ;;  %s82_s19 = int_to_ptr.hbm [resolvable:$true] %s81_s19  ;;  %s99_s21 = int_to_ptr.hbm [resolvable:$true] %s98_s21 }
   0xf   :  { %59 = dma.hbm_to_vmem [thread:$0]  %s52_s13, 1024, %s54_s0, [#allocation6], %s1453_s25, %s1453_s25, %s1454_s26  }
  0x10   :  { %s1458_s22 = smov [#allocation10]   ;;  %s1459_s24 = smov [#allocation11]  }
  0x11   :  { %s83_s23 = sshll.u32 %s1458_s22, 4  ;;  %s100_s6 = sshll.u32 %s1459_s24, 4  ;;  %s84_s23 = int_to_ptr.vmem [resolvable:$true] %s83_s23  ;;  %s101_s6 = int_to_ptr.vmem [resolvable:$true] %s100_s6 }
  0x12   :  { %89 = dma.hbm_to_vmem [thread:$0]  %s82_s19, 1024, %s84_s23, [#allocation9], %s1453_s25, %s1453_s25, %s1454_s26  }
  0x13   :  { %s1460_s27 = smov 128   ;;  %s1461_s28 = smov 8  }
  0x14   :  { %106 = dma.hbm_to_vmem [thread:$0]  %s99_s21, 2048, %s101_s6, [#allocation12], %s1460_s27, %s1460_s27, %s1461_s28  }
  0x15   :  { %1442 = dma.done.wait [#allocation3], 1024  }
  0x16   :  { %1443 = vsyncadd [#allocation3], 4294966272 }
  0x17   :  { %1444 = dma.done.wait [#allocation6], 2048  }
  0x18   :  { %1445 = vsyncadd [#allocation6], 4294965248 }
  0x19   :  { %1446 = dma.done.wait [#allocation9], 2048  }
  0x1a   :  { %1447 = vsyncadd [#allocation9], 4294965248 }
  0x1b   :  { %1448 = dma.done.wait [#allocation12], 2048  }
  0x1c   :  { %1449 = vsyncadd [#allocation12], 4294965248  ;;  %v1226_v0 = vld [vmem:[#allocation7 + $0x38] sm:$0xff]  ;;  %v1225_v1 = vld [vmem:[#allocation7 + $0x30] sm:$0xff]  ;;  %s1462_s12 = smov [#allocation13]   ;;  %s1030_s16 = sshll.u32 %s1682_s11, 4  ;;  %s1031_s16 = int_to_ptr.hbm [resolvable:$true] %s1030_s16 }
  0x1d   :  { %342 = vmatpush.bf16.msra.mxu0 %v1226_v0  ;;  %1243 = vmatpush.bf16.msra.mxu3 %v1226_v0  ;;  %v1224_v2 = vld [vmem:[#allocation7 + $0x28] sm:$0xff]  ;;  %v1223_v3 = vld [vmem:[#allocation7 + $0x20] sm:$0xff]  ;;  %v1222_v4 = vld [vmem:[#allocation7 + $0x18] sm:$0xff]  ;;  %s1028_s13 = sshll.u32 %s1462_s12, 4  ;;  %s1029_s13 = int_to_ptr.vmem [resolvable:$true] %s1028_s13 }
  0x1e   :  { %v1221_v5 = vld [vmem:[#allocation7 + $0x10] sm:$0xff]  ;;  %v1220_v6 = vld [vmem:[#allocation7 + $0x8] sm:$0xff]  ;;  %v1219_v7 = vld [vmem:[#allocation7] sm:$0xff] }
  0x1f   :  { %v1211_v8 = vld [vmem:[#allocation5] sm:$0xff]  ;;  %v1216_v9 = vld [vmem:[#allocation5 + $0x28] sm:$0xff]  ;;  %v1217_v11 = vld [vmem:[#allocation5 + $0x30] sm:$0xff] }
  0x20   :  { %v1212_v10 = vld [vmem:[#allocation5 + $0x8] sm:$0xff]  ;;  %v1213_v12 = vld [vmem:[#allocation5 + $0x10] sm:$0xff]  ;;  %v1218_v13 = vld [vmem:[#allocation5 + $0x38] sm:$0xff] }
  0x21   :  { %343 = vmatpush.bf16.msra.mxu0 %v1225_v1  ;;  %1244 = vmatpush.bf16.msra.mxu3 %v1225_v1  ;;  %v1214_v14 = vld [vmem:[#allocation5 + $0x18] sm:$0xff]  ;;  %v1215_v15 = vld [vmem:[#allocation5 + $0x20] sm:$0xff]  ;;  %v1559_v41 = vld [vmem:[#allocation2 + $0x8] sm:$0xff] }
  0x22   :  { %v1556_v40 = vld [vmem:[#allocation2] sm:$0xff]  ;;  %v1562_v42 = vld [vmem:[#allocation2 + $0x10] sm:$0xff]  ;;  %v1565_v43 = vld [vmem:[#allocation2 + $0x28] sm:$0xff] }
  0x23   :  { %v1234_v44 = vld [vmem:[#allocation8 + $0x38] sm:$0xff]  ;;  %v1233_v45 = vld [vmem:[#allocation8 + $0x30] sm:$0xff]  ;;  %v1232_v46 = vld [vmem:[#allocation8 + $0x28] sm:$0xff] }
  0x24   :  { %v1568_v47 = vld [vmem:[#allocation2 + $0x18] sm:$0xff]  ;;  %v1231_v48 = vld [vmem:[#allocation8 + $0x20] sm:$0xff]  ;;  %v1570_v49 = vld [vmem:[#allocation2 + $0x30] sm:$0xff] }
  0x25   :  { %344 = vmatpush.bf16.msra.mxu0 %v1224_v2  ;;  %1245 = vmatpush.bf16.msra.mxu3 %v1224_v2  ;;  %v1574_v50 = vld [vmem:[#allocation2 + $0x20] sm:$0xff]  ;;  %v1576_v51 = vld [vmem:[#allocation2 + $0x38] sm:$0xff]  ;;  %v1229_v53 = vld [vmem:[#allocation8 + $0x10] sm:$0xff] }
  0x26   :  { %v1230_v52 = vld [vmem:[#allocation8 + $0x18] sm:$0xff]  ;;  %v1228_v54 = vld [vmem:[#allocation8 + $0x8] sm:$0xff]  ;;  %v1227_v55 = vld [vmem:[#allocation8] sm:$0xff] }
  0x27   :  { %v1583_v57 = vld [vmem:[%s1674_s3] ss:$0 sm:$0xff] }
  0x29   :  { %345 = vmatpush.bf16.msra.mxu0 %v1223_v3  ;;  %1246 = vmatpush.bf16.msra.mxu3 %v1223_v3 }
  0x2d   :  { %346 = vmatpush.bf16.msra.mxu0 %v1222_v4  ;;  %1247 = vmatpush.bf16.msra.mxu3 %v1222_v4 }
  0x31   :  { %347 = vmatpush.bf16.msra.mxu0 %v1221_v5  ;;  %1248 = vmatpush.bf16.msra.mxu3 %v1221_v5 }
  0x35   :  { %348 = vmatpush.bf16.msra.mxu0 %v1220_v6  ;;  %1249 = vmatpush.bf16.msra.mxu3 %v1220_v6 }
  0x39   :  { %349 = vmatpush.bf16.msra.mxu0 %v1219_v7  ;;  %1250 = vmatpush.bf16.msra.mxu3 %v1219_v7 }
  0x3c   :  { %350 = vmatmul.bf16.vlgmr.msra.gmra.mxu0 %v1211_v8  ;;  %375 = vmatmul.bf16.vlgmr.msra.gmra.mxu3 %v1216_v9 }
  0x4c   :  { %355 = vmatmul.bf16.gmra.mxu0 %v1212_v10  ;;  %380 = vmatmul.bf16.gmra.mxu3 %v1217_v11 }
  0x5c   :  { %360 = vmatmul.bf16.gmra.mxu0 %v1213_v12  ;;  %385 = vmatmul.bf16.gmra.mxu3 %v1218_v13 }
  0x6c   :  { %365 = vmatmul.bf16.gmra.mxu0 %v1214_v14 }
  0x7c   :  { %370 = vmatmul.bf16.gmra.mxu0 %v1215_v15 }
  0xb9   :  { %v351_v16 = vpop.f32.mrf.mxu0 }
  0xbf   :  { %v376_v17 = vpop.f32.mrf.mxu3 }
  0xc1   :  { %v353_v18 = vpop.f32.mrf.mxu0 }
  0xc2   :  { %v391_v39 = vpack.c.bf16 %v353_v18, %v351_v16 }
  0xc7   :  { %v378_v19 = vpop.f32.mrf.mxu3 }
  0xc8   :  { %v396_v31 = vpack.c.bf16 %v378_v19, %v376_v17 }
  0xc9   :  { %v356_v20 = vpop.f32.mrf.mxu0 }
  0xcf   :  { %v381_v21 = vpop.f32.mrf.mxu3 }
  0xd1   :  { %v358_v22 = vpop.f32.mrf.mxu0 }
  0xd2   :  { %v392_v38 = vpack.c.bf16 %v358_v22, %v356_v20 }
  0xd7   :  { %v383_v23 = vpop.f32.mrf.mxu3 }
  0xd8   :  { %v397_v30 = vpack.c.bf16 %v383_v23, %v381_v21 }
  0xd9   :  { %v361_v24 = vpop.f32.mrf.mxu0 }
  0xdf   :  { %v386_v25 = vpop.f32.mrf.mxu3 }
  0xe1   :  { %v363_v26 = vpop.f32.mrf.mxu0 }
  0xe2   :  { %v393_v37 = vpack.c.bf16 %v363_v26, %v361_v24 }
  0xe7   :  { %v388_v27 = vpop.f32.mrf.mxu3 }
  0xe8   :  { %v398_v28 = vpack.c.bf16 %v388_v27, %v386_v25 }
  0xe9   :  { %v366_v29 = vpop.f32.mrf.mxu0 }
  0xea   :  { %451 = vmatpush.bf16.msra.mxu1 %v398_v28  ;;  %1251 = vmatpush.bf16.msra.mxu2 %v398_v28 }
  0xee   :  { %452 = vmatpush.bf16.msra.mxu1 %v397_v30  ;;  %1252 = vmatpush.bf16.msra.mxu2 %v397_v30 }
  0xf1   :  { %v368_v32 = vpop.f32.mrf.mxu0 }
  0xf2   :  { %453 = vmatpush.bf16.msra.mxu1 %v396_v31  ;;  %1253 = vmatpush.bf16.msra.mxu2 %v396_v31  ;;  %v394_v36 = vpack.c.bf16 %v368_v32, %v366_v29 }
  0xf9   :  { %v371_v33 = vpop.f32.mrf.mxu0 }
 0x101   :  { %v373_v34 = vpop.f32.mrf.mxu0 }
 0x102   :  { %v395_v35 = vpack.c.bf16 %v373_v34, %v371_v33 }
 0x104   :  { %454 = vmatpush.bf16.msra.mxu1 %v395_v35  ;;  %1254 = vmatpush.bf16.msra.mxu2 %v395_v35 }
 0x108   :  { %455 = vmatpush.bf16.msra.mxu1 %v394_v36  ;;  %1255 = vmatpush.bf16.msra.mxu2 %v394_v36 }
 0x10c   :  { %456 = vmatpush.bf16.msra.mxu1 %v393_v37  ;;  %1256 = vmatpush.bf16.msra.mxu2 %v393_v37 }
 0x110   :  { %457 = vmatpush.bf16.msra.mxu1 %v392_v38  ;;  %1257 = vmatpush.bf16.msra.mxu2 %v392_v38 }
 0x114   :  { %458 = vmatpush.bf16.msra.mxu1 %v391_v39  ;;  %1258 = vmatpush.bf16.msra.mxu2 %v391_v39 }
 0x117   :  { %459 = vmatmul.bf16.vlgmr.msra.gmra.mxu1 %v1556_v40  ;;  %484 = vmatmul.bf16.vlgmr.msra.gmra.mxu2 %v1565_v43 }
 0x118   :  { %604 = vmatpush.bf16.msrb.mxu2 %v1234_v44 }
 0x11c   :  { %605 = vmatpush.bf16.msrb.mxu2 %v1233_v45 }
 0x120   :  { %606 = vmatpush.bf16.msrb.mxu2 %v1232_v46 }
 0x124   :  { %607 = vmatpush.bf16.msrb.mxu2 %v1231_v48 }
 0x127   :  { %464 = vmatmul.bf16.gmra.mxu1 %v1559_v41  ;;  %489 = vmatmul.bf16.gmra.mxu2 %v1570_v49 }
 0x128   :  { %608 = vmatpush.bf16.msrb.mxu2 %v1230_v52 }
 0x12c   :  { %609 = vmatpush.bf16.msrb.mxu2 %v1229_v53 }
 0x130   :  { %610 = vmatpush.bf16.msrb.mxu2 %v1228_v54 }
 0x134   :  { %611 = vmatpush.bf16.msrb.mxu2 %v1227_v55 }
 0x137   :  { %469 = vmatmul.bf16.gmra.mxu1 %v1562_v42  ;;  %494 = vmatmul.bf16.gmra.mxu2 %v1576_v51 }
 0x147   :  { %474 = vmatmul.bf16.gmra.mxu1 %v1568_v47 }
 0x157   :  { %479 = vmatmul.bf16.gmra.mxu1 %v1574_v50 }
 0x194   :  { %v460_v56 = vpop.f32.mrf.mxu1 }
 0x195   :  { %v461_v58 = vadd.f32 %v1583_v57, %v460_v56 }
 0x197   :  { %v500_v61 = vmax.f32 %v461_v58, 0.0 }
 0x19a   :  { %v485_v26 = vpop.f32.mrf.mxu2 }
 0x19b   :  { %v486_v39 = vadd.f32 %v1583_v57, %v485_v26 }
 0x19c   :  { %v462_v59 = vpop.f32.mrf.mxu1 }
 0x19d   :  { %v463_v60 = vadd.f32 %v1583_v57, %v462_v59  ;;  %v510_v45 = vmax.f32 %v486_v39, 0.0 }
 0x19f   :  { %v501_v62 = vmax.f32 %v463_v60, 0.0  ;;  %v526_v48 = vmul.f32 0.0, %v510_v45 }
 0x1a1   :  { %v532_v63 = vpack.c.bf16 %v501_v62, %v500_v61 }
 0x1a2   :  { %v487_v31 = vpop.f32.mrf.mxu2 }
 0x1a3   :  { %612 = vmatmul.bf16.vlgmr.msrb.gmra.mxu2 %v532_v63  ;;  %v488_v44 = vadd.f32 %v1583_v57, %v487_v31  ;;  %v1242_v31 = vld [vmem:[#allocation10 + $0x38] sm:$0xff] }
 0x1a4   :  { %v465_v0 = vpop.f32.mrf.mxu1  ;;  %818 = vmatpush.bf16.msrb.mxu0 %v1242_v31 }
 0x1a5   :  { %v466_v1 = vadd.f32 %v1583_v57, %v465_v0  ;;  %v511_v46 = vmax.f32 %v488_v44, 0.0  ;;  %v1612_v44 = vld [vmem:[%s1676_s5] ss:$0 sm:$0xff] }
 0x1a7   :  { %v502_v3 = vmax.f32 %v466_v1, 0.0  ;;  %v527_v52 = vmul.f32 0.0, %v511_v46 }
 0x1a9   :  { %v518_v6 = vmul.f32 0.0, %v502_v3  ;;  %v537_v54 = vpack.c.bf16 %v527_v52, %v526_v48 }
 0x1aa   :  { %v490_v38 = vpop.f32.mrf.mxu2 }
 0x1ab   :  { %v491_v55 = vadd.f32 %v1583_v57, %v490_v38  ;;  %v1235_v38 = vld [vmem:[#allocation10] sm:$0xff] }
 0x1ac   :  { %v467_v2 = vpop.f32.mrf.mxu1 }
 0x1ad   :  { %v468_v4 = vadd.f32 %v1583_v57, %v467_v2  ;;  %v512_v59 = vmax.f32 %v491_v55, 0.0 }
 0x1af   :  { %v503_v5 = vmax.f32 %v468_v4, 0.0  ;;  %v528_v61 = vmul.f32 0.0, %v512_v59 }
 0x1b1   :  { %v519_v7 = vmul.f32 0.0, %v503_v5 }
 0x1b2   :  { %v492_v53 = vpop.f32.mrf.mxu2 }
 0x1b3   :  { %v533_v8 = vpack.c.bf16 %v519_v7, %v518_v6  ;;  %v493_v56 = vadd.f32 %v1583_v57, %v492_v53 }
 0x1b4   :  { %v470_v9 = vpop.f32.mrf.mxu1 }
 0x1b5   :  { %617 = vmatmul.bf16.gmra.mxu2 %v533_v8  ;;  %v471_v10 = vadd.f32 %v1583_v57, %v470_v9  ;;  %v513_v60 = vmax.f32 %v493_v56, 0.0 }
 0x1b7   :  { %v504_v12 = vmax.f32 %v471_v10, 0.0  ;;  %v529_v62 = vmul.f32 0.0, %v513_v60 }
 0x1b9   :  { %v520_v15 = vmul.f32 0.0, %v504_v12  ;;  %v538_v63 = vpack.c.bf16 %v529_v62, %v528_v61 }
 0x1ba   :  { %v495_v58 = vpop.f32.mrf.mxu2 }
 0x1bb   :  { %v496_v1 = vadd.f32 %v1583_v57, %v495_v58 }
 0x1bc   :  { %v472_v11 = vpop.f32.mrf.mxu1 }
 0x1bd   :  { %v473_v13 = vadd.f32 %v1583_v57, %v472_v11  ;;  %v514_v3 = vmax.f32 %v496_v1, 0.0 }
 0x1bf   :  { %v505_v14 = vmax.f32 %v473_v13, 0.0  ;;  %v530_v5 = vmul.f32 0.0, %v514_v3 }
 0x1c1   :  { %v521_v16 = vmul.f32 0.0, %v505_v14 }
 0x1c2   :  { %v497_v0 = vpop.f32.mrf.mxu2 }
 0x1c3   :  { %v534_v17 = vpack.c.bf16 %v521_v16, %v520_v15  ;;  %v498_v2 = vadd.f32 %v1583_v57, %v497_v0 }
 0x1c4   :  { %v475_v18 = vpop.f32.mrf.mxu1 }
 0x1c5   :  { %622 = vmatmul.bf16.gmra.mxu2 %v534_v17  ;;  %v476_v19 = vadd.f32 %v1583_v57, %v475_v18  ;;  %v515_v4 = vmax.f32 %v498_v2, 0.0 }
 0x1c7   :  { %v506_v21 = vmax.f32 %v476_v19, 0.0  ;;  %v531_v6 = vmul.f32 0.0, %v515_v4 }
 0x1c9   :  { %v522_v24 = vmul.f32 0.0, %v506_v21  ;;  %v539_v7 = vpack.c.bf16 %v531_v6, %v530_v5 }
 0x1cc   :  { %v477_v20 = vpop.f32.mrf.mxu1 }
 0x1cd   :  { %v478_v22 = vadd.f32 %v1583_v57, %v477_v20 }
 0x1cf   :  { %v507_v23 = vmax.f32 %v478_v22, 0.0 }
 0x1d1   :  { %v523_v25 = vmul.f32 0.0, %v507_v23 }
 0x1d3   :  { %v535_v27 = vpack.c.bf16 %v523_v25, %v522_v24 }
 0x1d4   :  { %v480_v28 = vpop.f32.mrf.mxu1 }
 0x1d5   :  { %627 = vmatmul.bf16.gmra.mxu2 %v535_v27  ;;  %v481_v29 = vadd.f32 %v1583_v57, %v480_v28 }
 0x1d7   :  { %v508_v32 = vmax.f32 %v481_v29, 0.0 }
 0x1d9   :  { %v524_v35 = vmul.f32 0.0, %v508_v32  ;;  %v1241_v32 = vld [vmem:[#allocation10 + $0x30] sm:$0xff] }
 0x1da   :  { %819 = vmatpush.bf16.msrb.mxu0 %v1241_v32 }
 0x1dc   :  { %v482_v30 = vpop.f32.mrf.mxu1 }
 0x1dd   :  { %v483_v33 = vadd.f32 %v1583_v57, %v482_v30 }
 0x1df   :  { %v509_v34 = vmax.f32 %v483_v33, 0.0  ;;  %v1240_v33 = vld [vmem:[#allocation10 + $0x28] sm:$0xff] }
 0x1e0   :  { %820 = vmatpush.bf16.msrb.mxu0 %v1240_v33 }
 0x1e1   :  { %v525_v36 = vmul.f32 0.0, %v509_v34  ;;  %v1239_v34 = vld [vmem:[#allocation10 + $0x20] sm:$0xff] }
 0x1e3   :  { %v536_v37 = vpack.c.bf16 %v525_v36, %v524_v35  ;;  %v1238_v35 = vld [vmem:[#allocation10 + $0x18] sm:$0xff]  ;;  %v1237_v36 = vld [vmem:[#allocation10 + $0x10] sm:$0xff] }
 0x1e4   :  { %821 = vmatpush.bf16.msrb.mxu0 %v1239_v34 }
 0x1e5   :  { %632 = vmatmul.bf16.gmra.mxu2 %v536_v37  ;;  %v1236_v37 = vld [vmem:[#allocation10 + $0x8] sm:$0xff] }
 0x1e8   :  { %822 = vmatpush.bf16.msrb.mxu0 %v1238_v35 }
 0x1ec   :  { %823 = vmatpush.bf16.msrb.mxu0 %v1237_v36 }
 0x1f0   :  { %824 = vmatpush.bf16.msrb.mxu0 %v1236_v37 }
 0x1f4   :  { %825 = vmatpush.bf16.msrb.mxu0 %v1235_v38 }
 0x1f5   :  { %637 = vmatmul.bf16.gmra.mxu2 %v537_v54 }
 0x205   :  { %642 = vmatmul.bf16.gmra.mxu2 %v538_v63 }
 0x215   :  { %647 = vmatmul.bf16.gmra.mxu2 %v539_v7 }
 0x226   :  { %v613_v8 = vpop.f32.mrf.mxu2 }
 0x22e   :  { %v615_v9 = vpop.f32.mrf.mxu2 }
 0x22f   :  { %v653_v10 = vpack.c.bf16 %v615_v9, %v613_v8 }
 0x238   :  { %v618_v11 = vpop.f32.mrf.mxu2 }
 0x240   :  { %v620_v12 = vpop.f32.mrf.mxu2 }
 0x241   :  { %v654_v13 = vpack.c.bf16 %v620_v12, %v618_v11 }
 0x248   :  { %v623_v14 = vpop.f32.mrf.mxu2 }
 0x250   :  { %v625_v15 = vpop.f32.mrf.mxu2 }
 0x251   :  { %v655_v16 = vpack.c.bf16 %v625_v15, %v623_v14 }
 0x258   :  { %v628_v17 = vpop.f32.mrf.mxu2 }
 0x260   :  { %v630_v18 = vpop.f32.mrf.mxu2 }
 0x261   :  { %v656_v19 = vpack.c.bf16 %v630_v18, %v628_v17 }
 0x268   :  { %v633_v20 = vpop.f32.mrf.mxu2 }
 0x270   :  { %v635_v57 = vpop.f32.mrf.mxu2 }
 0x271   :  { %v657_v30 = vpack.c.bf16 %v635_v57, %v633_v20 }
 0x278   :  { %v638_v21 = vpop.f32.mrf.mxu2 }
 0x280   :  { %v640_v22 = vpop.f32.mrf.mxu2 }
 0x281   :  { %v658_v29 = vpack.c.bf16 %v640_v22, %v638_v21 }
 0x288   :  { %v643_v23 = vpop.f32.mrf.mxu2 }
 0x290   :  { %v645_v24 = vpop.f32.mrf.mxu2 }
 0x291   :  { %v659_v28 = vpack.c.bf16 %v645_v24, %v643_v23 }
 0x298   :  { %v648_v25 = vpop.f32.mrf.mxu2 }
 0x2a0   :  { %v650_v26 = vpop.f32.mrf.mxu2 }
 0x2a1   :  { %v660_v27 = vpack.c.bf16 %v650_v26, %v648_v25 }
 0x2a3   :  { %665 = vmatpush.bf16.msrb.mxu3 %v660_v27 }
 0x2a7   :  { %666 = vmatpush.bf16.msrb.mxu3 %v659_v28 }
 0x2ab   :  { %667 = vmatpush.bf16.msrb.mxu3 %v658_v29 }
 0x2af   :  { %668 = vmatpush.bf16.msrb.mxu3 %v657_v30 }
 0x2b3   :  { %669 = vmatpush.bf16.msrb.mxu3 %v656_v19 }
 0x2b7   :  { %670 = vmatpush.bf16.msrb.mxu3 %v655_v16 }
 0x2bb   :  { %671 = vmatpush.bf16.msrb.mxu3 %v654_v13 }
 0x2bf   :  { %672 = vmatpush.bf16.msrb.mxu3 %v653_v10 }
 0x2c2   :  { %673 = vmatmul.bf16.vlgmr.msrb.gmra.mxu3 %v1556_v40 }
 0x2d2   :  { %678 = vmatmul.bf16.gmra.mxu3 %v1559_v41 }
 0x2e2   :  { %683 = vmatmul.bf16.gmra.mxu3 %v1562_v42 }
 0x2f2   :  { %688 = vmatmul.bf16.gmra.mxu3 %v1568_v47 }
 0x302   :  { %693 = vmatmul.bf16.gmra.mxu3 %v1574_v50 }
 0x312   :  { %698 = vmatmul.bf16.gmra.mxu3 %v1565_v43 }
 0x322   :  { %703 = vmatmul.bf16.gmra.mxu3 %v1570_v49 }
 0x332   :  { %708 = vmatmul.bf16.gmra.mxu3 %v1576_v51 }
 0x345   :  { %v674_v39 = vpop.f32.mrf.mxu3 }
 0x346   :  { %v675_v45 = vadd.f32 %v1612_v44, %v674_v39 }
 0x348   :  { %v714_v52 = vmax.f32 %v675_v45, 0.0 }
 0x34d   :  { %v676_v46 = vpop.f32.mrf.mxu3 }
 0x34e   :  { %v677_v48 = vadd.f32 %v1612_v44, %v676_v46 }
 0x350   :  { %v715_v53 = vmax.f32 %v677_v48, 0.0 }
 0x352   :  { %v746_v54 = vpack.c.bf16 %v715_v53, %v714_v52 }
 0x354   :  { %826 = vmatmul.bf16.vlgmr.msrb.gmra.mxu0 %v746_v54 }
 0x355   :  { %v679_v55 = vpop.f32.mrf.mxu3 }
 0x356   :  { %v680_v56 = vadd.f32 %v1612_v44, %v679_v55 }
 0x358   :  { %v716_v59 = vmax.f32 %v680_v56, 0.0 }
 0x35a   :  { %v732_v62 = vmul.f32 0.0, %v716_v59 }
 0x35d   :  { %v681_v58 = vpop.f32.mrf.mxu3 }
 0x35e   :  { %v682_v60 = vadd.f32 %v1612_v44, %v681_v58 }
 0x360   :  { %v717_v61 = vmax.f32 %v682_v60, 0.0 }
 0x362   :  { %v733_v63 = vmul.f32 0.0, %v717_v61 }
 0x364   :  { %v747_v0 = vpack.c.bf16 %v733_v63, %v732_v62 }
 0x365   :  { %v684_v1 = vpop.f32.mrf.mxu3 }
 0x366   :  { %831 = vmatmul.bf16.gmra.mxu0 %v747_v0  ;;  %v685_v2 = vadd.f32 %v1612_v44, %v684_v1 }
 0x368   :  { %v718_v4 = vmax.f32 %v685_v2, 0.0 }
 0x36a   :  { %v734_v7 = vmul.f32 0.0, %v718_v4 }
 0x36d   :  { %v686_v3 = vpop.f32.mrf.mxu3 }
 0x36e   :  { %v687_v5 = vadd.f32 %v1612_v44, %v686_v3 }
 0x370   :  { %v719_v6 = vmax.f32 %v687_v5, 0.0 }
 0x372   :  { %v735_v8 = vmul.f32 0.0, %v719_v6 }
 0x374   :  { %v748_v9 = vpack.c.bf16 %v735_v8, %v734_v7 }
 0x375   :  { %v689_v10 = vpop.f32.mrf.mxu3 }
 0x376   :  { %836 = vmatmul.bf16.gmra.mxu0 %v748_v9  ;;  %v690_v11 = vadd.f32 %v1612_v44, %v689_v10 }
 0x378   :  { %v720_v13 = vmax.f32 %v690_v11, 0.0 }
 0x37a   :  { %v736_v16 = vmul.f32 0.0, %v720_v13 }
 0x37d   :  { %v691_v12 = vpop.f32.mrf.mxu3 }
 0x37e   :  { %v692_v14 = vadd.f32 %v1612_v44, %v691_v12 }
 0x380   :  { %v721_v15 = vmax.f32 %v692_v14, 0.0 }
 0x382   :  { %v737_v17 = vmul.f32 0.0, %v721_v15 }
 0x384   :  { %v749_v18 = vpack.c.bf16 %v737_v17, %v736_v16 }
 0x385   :  { %v694_v19 = vpop.f32.mrf.mxu3 }
 0x386   :  { %841 = vmatmul.bf16.gmra.mxu0 %v749_v18  ;;  %v695_v20 = vadd.f32 %v1612_v44, %v694_v19 }
 0x388   :  { %v722_v21 = vmax.f32 %v695_v20, 0.0 }
 0x38a   :  { %v738_v24 = vmul.f32 0.0, %v722_v21 }
 0x38d   :  { %v696_v57 = vpop.f32.mrf.mxu3 }
 0x38e   :  { %v697_v22 = vadd.f32 %v1612_v44, %v696_v57 }
 0x390   :  { %v723_v23 = vmax.f32 %v697_v22, 0.0 }
 0x392   :  { %v739_v25 = vmul.f32 0.0, %v723_v23  ;;  %v1272_v23 = vld [vmem:[%s1678_s7] ss:$0 sm:$0xff] }
 0x394   :  { %v750_v26 = vpack.c.bf16 %v739_v25, %v738_v24 }
 0x395   :  { %v699_v27 = vpop.f32.mrf.mxu3 }
 0x396   :  { %846 = vmatmul.bf16.gmra.mxu0 %v750_v26  ;;  %v700_v28 = vadd.f32 %v1612_v44, %v699_v27 }
 0x398   :  { %v724_v30 = vmax.f32 %v700_v28, 0.0 }
 0x39a   :  { %v740_v33 = vmul.f32 0.0, %v724_v30 }
 0x39d   :  { %v701_v29 = vpop.f32.mrf.mxu3 }
 0x39e   :  { %v702_v31 = vadd.f32 %v1612_v44, %v701_v29 }
 0x3a0   :  { %v725_v32 = vmax.f32 %v702_v31, 0.0 }
 0x3a2   :  { %v741_v34 = vmul.f32 0.0, %v725_v32 }
 0x3a4   :  { %v751_v35 = vpack.c.bf16 %v741_v34, %v740_v33 }
 0x3a5   :  { %v704_v36 = vpop.f32.mrf.mxu3 }
 0x3a6   :  { %851 = vmatmul.bf16.gmra.mxu0 %v751_v35  ;;  %v705_v37 = vadd.f32 %v1612_v44, %v704_v36 }
 0x3a8   :  { %v726_v39 = vmax.f32 %v705_v37, 0.0 }
 0x3aa   :  { %v742_v48 = vmul.f32 0.0, %v726_v39 }
 0x3ad   :  { %v706_v38 = vpop.f32.mrf.mxu3 }
 0x3ae   :  { %v707_v45 = vadd.f32 %v1612_v44, %v706_v38 }
 0x3b0   :  { %v727_v46 = vmax.f32 %v707_v45, 0.0 }
 0x3b2   :  { %v743_v52 = vmul.f32 0.0, %v727_v46 }
 0x3b4   :  { %v752_v53 = vpack.c.bf16 %v743_v52, %v742_v48 }
 0x3b5   :  { %v709_v54 = vpop.f32.mrf.mxu3 }
 0x3b6   :  { %856 = vmatmul.bf16.gmra.mxu0 %v752_v53  ;;  %v710_v55 = vadd.f32 %v1612_v44, %v709_v54 }
 0x3b8   :  { %v728_v58 = vmax.f32 %v710_v55, 0.0 }
 0x3ba   :  { %v744_v61 = vmul.f32 0.0, %v728_v58 }
 0x3bd   :  { %v711_v56 = vpop.f32.mrf.mxu3 }
 0x3be   :  { %v712_v59 = vadd.f32 %v1612_v44, %v711_v56 }
 0x3c0   :  { %v729_v60 = vmax.f32 %v712_v59, 0.0 }
 0x3c2   :  { %v745_v62 = vmul.f32 0.0, %v729_v60 }
 0x3c4   :  { %v753_v63 = vpack.c.bf16 %v745_v62, %v744_v61 }
 0x3c6   :  { %861 = vmatmul.bf16.gmra.mxu0 %v753_v63 }
 0x3d1   :  { %v827_v0 = vpop.f32.mrf.mxu0 }
 0x3d9   :  { %v829_v1 = vpop.f32.mrf.mxu0 }
 0x3da   :  { %v867_v2 = vpack.c.bf16 %v829_v1, %v827_v0 }
 0x3e3   :  { %v832_v3 = vpop.f32.mrf.mxu0 }
 0x3eb   :  { %v834_v4 = vpop.f32.mrf.mxu0 }
 0x3ec   :  { %v868_v5 = vpack.c.bf16 %v834_v4, %v832_v3 }
 0x3f3   :  { %v837_v6 = vpop.f32.mrf.mxu0 }
 0x3fb   :  { %v839_v7 = vpop.f32.mrf.mxu0 }
 0x3fc   :  { %v869_v8 = vpack.c.bf16 %v839_v7, %v837_v6 }
 0x403   :  { %v842_v9 = vpop.f32.mrf.mxu0 }
 0x40b   :  { %v844_v10 = vpop.f32.mrf.mxu0 }
 0x40c   :  { %v870_v11 = vpack.c.bf16 %v844_v10, %v842_v9 }
 0x413   :  { %v847_v12 = vpop.f32.mrf.mxu0 }
 0x41b   :  { %v849_v13 = vpop.f32.mrf.mxu0 }
 0x41c   :  { %v871_v21 = vpack.c.bf16 %v849_v13, %v847_v12 }
 0x423   :  { %v852_v44 = vpop.f32.mrf.mxu0 }
 0x42b   :  { %v854_v14 = vpop.f32.mrf.mxu0 }
 0x42c   :  { %v872_v57 = vpack.c.bf16 %v854_v14, %v852_v44 }
 0x433   :  { %v857_v15 = vpop.f32.mrf.mxu0 }
 0x43b   :  { %v859_v16 = vpop.f32.mrf.mxu0 }
 0x43c   :  { %v873_v20 = vpack.c.bf16 %v859_v16, %v857_v15 }
 0x443   :  { %v862_v17 = vpop.f32.mrf.mxu0 }
 0x44b   :  { %v864_v18 = vpop.f32.mrf.mxu0 }
 0x44c   :  { %v874_v19 = vpack.c.bf16 %v864_v18, %v862_v17  ;;  %v997_v18 = vld [vmem:[#allocation11 + $0x78] sm:$0xff] }
 0x44d   :  { %1002 = vmatpush.msra.mxu3 %v997_v18 }
 0x44e   :  { %879 = vmatpush.bf16.msrb.mxu1 %v874_v19  ;;  %v996_v19 = vld [vmem:[#allocation11 + $0x70] sm:$0xff] }
 0x44f   :  { %1003 = vmatpush.msra.mxu3 %v996_v19 }
 0x452   :  { %880 = vmatpush.bf16.msrb.mxu1 %v873_v20 }
 0x456   :  { %881 = vmatpush.bf16.msrb.mxu1 %v872_v57 }
 0x45a   :  { %882 = vmatpush.bf16.msrb.mxu1 %v871_v21 }
 0x45e   :  { %883 = vmatpush.bf16.msrb.mxu1 %v870_v11 }
 0x462   :  { %884 = vmatpush.bf16.msrb.mxu1 %v869_v8 }
 0x466   :  { %885 = vmatpush.bf16.msrb.mxu1 %v868_v5 }
 0x46a   :  { %886 = vmatpush.bf16.msrb.mxu1 %v867_v2 }
 0x46d   :  { %887 = vmatmul.bf16.vlgmr.msrb.gmra.mxu1 %v1556_v40 }
 0x47d   :  { %892 = vmatmul.bf16.gmra.mxu1 %v1559_v41 }
 0x48d   :  { %897 = vmatmul.bf16.gmra.mxu1 %v1562_v42 }
 0x49d   :  { %902 = vmatmul.bf16.gmra.mxu1 %v1568_v47 }
 0x4ad   :  { %907 = vmatmul.bf16.gmra.mxu1 %v1574_v50 }
 0x4bd   :  { %912 = vmatmul.bf16.gmra.mxu1 %v1565_v43 }
 0x4cd   :  { %917 = vmatmul.bf16.gmra.mxu1 %v1570_v49 }
 0x4dd   :  { %922 = vmatmul.bf16.gmra.mxu1 %v1576_v51 }
 0x4ea   :  { %v888_v22 = vpop.f32.mrf.mxu1 }
 0x4eb   :  { %v889_v40 = vadd.f32 %v1272_v23, %v888_v22  ;;  %v995_v22 = vld [vmem:[#allocation11 + $0x68] sm:$0xff] }
 0x4ec   :  { %1004 = vmatpush.msra.mxu3 %v995_v22 }
 0x4ed   :  { %v928_v25 = vmax.f32 %v889_v40, 0.0 }
 0x4f2   :  { %v890_v24 = vpop.f32.mrf.mxu1 }
 0x4f3   :  { %v891_v41 = vadd.f32 %v1272_v23, %v890_v24 }
 0x4f5   :  { %v929_v42 = vmax.f32 %v891_v41, 0.0 }
 0x4f7   :  { %v1641_v26 = vpack.c.bf16 %v929_v42, %v928_v25  ;;  %v994_v25 = vld [vmem:[#allocation11 + $0x60] sm:$0xff] }
 0x4f8   :  { %1005 = vmatpush.msra.mxu3 %v994_v25 }
 0x4fa   :  { %v893_v47 = vpop.f32.mrf.mxu1 }
 0x4fb   :  { %v894_v50 = vadd.f32 %v1272_v23, %v893_v47 }
 0x4fd   :  { %v930_v43 = vmax.f32 %v894_v50, 0.0  ;;  %v993_v50 = vld [vmem:[#allocation11 + $0x58] sm:$0xff] }
 0x4fe   :  { %1006 = vmatpush.msra.mxu3 %v993_v50 }
 0x4ff   :  { %v1643_v29 = vmul.f32 0.0, %v930_v43 }
 0x502   :  { %v895_v27 = vpop.f32.mrf.mxu1 }
 0x503   :  { %v896_v28 = vadd.f32 %v1272_v23, %v895_v27 }
 0x505   :  { %v931_v49 = vmax.f32 %v896_v28, 0.0  ;;  %v992_v28 = vld [vmem:[#allocation11 + $0x50] sm:$0xff] }
 0x506   :  { %1007 = vmatpush.msra.mxu3 %v992_v28 }
 0x507   :  { %v1645_v51 = vmul.f32 0.0, %v931_v49  ;;  %v991_v49 = vld [vmem:[#allocation11 + $0x48] sm:$0xff] }
 0x508   :  { %1008 = vmatpush.msra.mxu3 %v991_v49 }
 0x509   :  { %v961_v30 = vpack.c.bf16 %v1645_v51, %v1643_v29  ;;  %v1273_v29 = vld [vmem:[%s1681_s10] ss:$0 sm:$0xff] }
 0x50a   :  { %v898_v31 = vpop.f32.mrf.mxu1 }
 0x50b   :  { %v899_v32 = vadd.f32 %v1272_v23, %v898_v31 }
 0x50d   :  { %v932_v34 = vmax.f32 %v899_v32, 0.0  ;;  %v990_v32 = vld [vmem:[#allocation11 + $0x40] sm:$0xff] }
 0x50e   :  { %1009 = vmatpush.msra.mxu3 %v990_v32 }
 0x50f   :  { %v1649_v37 = vmul.f32 0.0, %v932_v34  ;;  %v988_v34 = vld [vmem:[#allocation11 + $0x30] sm:$0xff] }
 0x512   :  { %v900_v33 = vpop.f32.mrf.mxu1 }
 0x513   :  { %v901_v35 = vadd.f32 %v1272_v23, %v900_v33  ;;  %v989_v33 = vld [vmem:[#allocation11 + $0x38] sm:$0xff] }
 0x514   :  { %1010 = vmatpush.msra.mxu3 %v989_v33 }
 0x515   :  { %v933_v36 = vmax.f32 %v901_v35, 0.0  ;;  %v987_v35 = vld [vmem:[#allocation11 + $0x28] sm:$0xff] }
 0x516   :  { %1011 = vmatpush.msra.mxu3 %v988_v34 }
 0x517   :  { %v1651_v38 = vmul.f32 0.0, %v933_v36  ;;  %v986_v36 = vld [vmem:[#allocation11 + $0x20] sm:$0xff] }
 0x518   :  { %1012 = vmatpush.msra.mxu3 %v987_v35 }
 0x519   :  { %v962_v39 = vpack.c.bf16 %v1651_v38, %v1649_v37  ;;  %v982_v37 = vld [vmem:[#allocation11] sm:$0xff] }
 0x51a   :  { %v903_v45 = vpop.f32.mrf.mxu1  ;;  %1013 = vmatpush.msra.mxu3 %v986_v36 }
 0x51b   :  { %v904_v46 = vadd.f32 %v1272_v23, %v903_v45  ;;  %v985_v45 = vld [vmem:[#allocation11 + $0x18] sm:$0xff] }
 0x51c   :  { %1014 = vmatpush.msra.mxu3 %v985_v45 }
 0x51d   :  { %v934_v52 = vmax.f32 %v904_v46, 0.0  ;;  %v984_v46 = vld [vmem:[#allocation11 + $0x10] sm:$0xff] }
 0x51e   :  { %1015 = vmatpush.msra.mxu3 %v984_v46 }
 0x51f   :  { %v950_v55 = vmul.f32 0.0, %v934_v52  ;;  %v968_v52 = vld [vmem:[%s1679_s8] sm:$0xf] }
 0x522   :  { %v905_v48 = vpop.f32.mrf.mxu1 }
 0x523   :  { %v906_v53 = vadd.f32 %v1272_v23, %v905_v48  ;;  %v983_v48 = vld [vmem:[#allocation11 + $0x8] sm:$0xff] }
 0x524   :  { %1016 = vmatpush.msra.mxu3 %v983_v48 }
 0x525   :  { %v935_v54 = vmax.f32 %v906_v53, 0.0 }
 0x526   :  { %1017 = vmatpush.msra.mxu3 %v982_v37 }
 0x527   :  { %v951_v56 = vmul.f32 0.0, %v935_v54 }
 0x529   :  { %v963_v58 = vpack.c.bf16 %v951_v56, %v950_v55 }
 0x52a   :  { %v908_v59 = vpop.f32.mrf.mxu1 }
 0x52b   :  { %v909_v20 = vadd.f32 %v1272_v23, %v908_v59 }
 0x52d   :  { %v936_v42 = vmax.f32 %v909_v20, 0.0 }
 0x532   :  { %v910_v60 = vpop.f32.mrf.mxu1 }
 0x533   :  { %v911_v14 = vadd.f32 %v1272_v23, %v910_v60 }
 0x535   :  { %v937_v40 = vmax.f32 %v911_v14, 0.0 }
 0x537   :  { %v953_v27 = vmul.f32 0.0, %v937_v40 }
 0x53a   :  { %v913_v61 = vpop.f32.mrf.mxu1 }
 0x53b   :  { %v914_v11 = vadd.f32 %v1272_v23, %v913_v61 }
 0x53d   :  { %v938_v57 = vmax.f32 %v914_v11, 0.0 }
 0x53f   :  { %v954_v47 = vmul.f32 0.0, %v938_v57 }
 0x542   :  { %v915_v62 = vpop.f32.mrf.mxu1 }
 0x543   :  { %v916_v8 = vadd.f32 %v1272_v23, %v915_v62 }
 0x545   :  { %v939_v15 = vmax.f32 %v916_v8, 0.0 }
 0x547   :  { %v955_v24 = vmul.f32 0.0, %v939_v15 }
 0x549   :  { %v965_v43 = vpack.c.bf16 %v955_v24, %v954_v47 }
 0x54a   :  { %v918_v63 = vpop.f32.mrf.mxu1 }
 0x54b   :  { %v919_v5 = vadd.f32 %v1272_v23, %v918_v63 }
 0x54d   :  { %v940_v12 = vmax.f32 %v919_v5, 0.0 }
 0x54f   :  { %v956_v21 = vmul.f32 0.0, %v940_v12 }
 0x552   :  { %v920_v0 = vpop.f32.mrf.mxu1 }
 0x553   :  { %v921_v3 = vadd.f32 %v1272_v23, %v920_v0 }
 0x555   :  { %v941_v9 = vmax.f32 %v921_v3, 0.0 }
 0x557   :  { %v957_v16 = vmul.f32 0.0, %v941_v9 }
 0x559   :  { %v966_v41 = vpack.c.bf16 %v957_v16, %v956_v21 }
 0x55a   :  { %v923_v1 = vpop.f32.mrf.mxu1 }
 0x55b   :  { %v924_v2 = vadd.f32 %v1272_v23, %v923_v1 }
 0x55d   :  { %v942_v6 = vmax.f32 %v924_v2, 0.0 }
 0x55f   :  { %v958_v13 = vmul.f32 0.0, %v942_v6 }
 0x562   :  { %v925_v4 = vpop.f32.mrf.mxu1 }
 0x563   :  { %v926_v7 = vadd.f32 %v1272_v23, %v925_v4  ;;  %v952_v23 = vmul.f32 0.0, %v936_v42 }
 0x565   :  { %v943_v10 = vmax.f32 %v926_v7, 0.0  ;;  %v964_v31 = vpack.c.bf16 %v953_v27, %v952_v23 }
 0x567   :  { %v959_v44 = vmul.f32 0.0, %v943_v10 }
 0x569   :  { %v967_v17 = vpack.c.bf16 %v959_v44, %v958_v13 }
 0x56b   :  { %969 = vmatpush.bf16.msra.mxu2 %v967_v17 }
 0x56f   :  { %970 = vmatpush.bf16.msra.mxu2 %v966_v41 }
 0x573   :  { %971 = vmatpush.bf16.msra.mxu2 %v965_v43 }
 0x577   :  { %972 = vmatpush.bf16.msra.mxu2 %v964_v31 }
 0x57b   :  { %973 = vmatpush.bf16.msra.mxu2 %v963_v58 }
 0x57f   :  { %974 = vmatpush.bf16.msra.mxu2 %v962_v39 }
 0x583   :  { %975 = vmatpush.bf16.msra.mxu2 %v961_v30 }
 0x587   :  { %976 = vmatpush.bf16.msra.mxu2 %v1641_v26 }
 0x58a   :  { %977 = vmatmul.bf16.vlgmr.msra.gmra.mxu2 %v968_v52 }
 0x60d   :  { %v978_v38 = vpop.f32.mrf.mxu2 }
 0x60e   :  { %1018 = vmatmul.f32.vlgmr.msra.gmra.mxu3 %v978_v38 }
 0x615   :  { %v980_v39 = vpop.f32.mrf.mxu2 }
 0x691   :  { %v1019_v26 = vpop.f32.mrf.mxu3 }
 0x692   :  { %v1020_v51 = vadd.f32 %v1273_v29, %v1019_v26 }
 0x694   :  { %1022 = vst [vmem:[#allocation13] sm:$0xff] %v1020_v51 }
 0x695   :  { %1033 = dma.vmem_to_hbm [thread:$0]  %s1029_s13, 128, %s1031_s16, [#allocation4]  }
 0x696   :  { %1450 = dma.done.wait [#allocation4], 128  }
 0x697   :  { %1451 = vsyncadd [#allocation4], 4294967168 }
 0x698   :  { %1038 = vsyncpa [#allocation3], 1 }
 0x699   :  { %1039 = vsyncpa [#allocation6], 1 }
 0x69a   :  { %1040 = vsyncpa [#allocation9], 1 }
 0x69b   :  { %1041 = vsyncpa [#allocation12], 1 }
 0x69c   :  { %1042 = vsyncpa [#allocation4], 1 }

</bundles_post_ra>
